<compile_context>
chip_gen: v7x
topology: tpu7x:2x2x1
jax: 0.10.0
libtpu: 0.0.40
codegen_flags: <defaults>
</compile_context>

<pallas_src>
import jax
import jax.numpy as jnp
from jax.experimental import pallas as pl
from jax.experimental.pallas import tpu as pltpu


def _round_up(n, m):
    return ((n + m - 1) // m) * m


def _vmem_capacity_bytes():
    """Physical VMEM of the attached TPU; falls back to 128 MiB (v5e/v6e)."""
    try:
        return int(pltpu.get_tpu_info().vmem_capacity_bytes)
    except (AttributeError, RuntimeError, ValueError, NotImplementedError):
        return 128 * 2 ** 20


# ---------------------------------------------------------------------------
# Kernel: fused Linear -> ReLU -> Linear -> Sigmoid for one batch tile.
# ---------------------------------------------------------------------------
def decoder_mlp_kernel(x_ref, w1_ref, b1_ref, w2_ref, b2_ref, o_ref):
    # x arrives in its native dtype; cast to the MXU dtype here (VPU) instead
    # of paying an extra wrapper-side pad/cast HBM pass.
    x = x_ref[...].astype(w1_ref.dtype)
    h = jnp.dot(x, w1_ref[...], preferred_element_type=jnp.float32)      # MXU
    h = jnp.maximum(h + b1_ref[...], 0.0)                                # VPU, f32
    z = jnp.dot(h.astype(w2_ref.dtype), w2_ref[...],
                preferred_element_type=jnp.float32)                      # MXU
    z = z + b2_ref[...]
    o_ref[...] = jax.nn.sigmoid(z).astype(o_ref.dtype)                   # EUP
    # TODO(synk): when 2*(F*Hp + Hp*Lp) bf16 bytes exceed ~half the per-gen
    # VMEM budget (mainly v7x's 64 MiB), add an "arbitrary" K grid axis over F
    # with an f32 VMEM accumulator (pl.when init/finalize) instead of keeping
    # W1/W2 fully resident.


# ---------------------------------------------------------------------------
# One-time weight preparation (hoisted out of the per-call path).
# ---------------------------------------------------------------------------
def prepare_params(w1, b1, w2, b2, *, mxu_dtype=jnp.bfloat16, lane=128):
    """Pad hidden/latent dims to lane-dense multiples of `lane` and cast the
    weights to the MXU dtype ONCE.  Padded hidden units contribute exactly 0
    (ReLU(0)=0 hits zero rows of W2); padded output lanes are sliced off."""
    F, H = w1.shape
    L = w2.shape[1]
    Hp = _round_up(H, lane)
    Lp = _round_up(L, lane)
    f32 = jnp.float32
    return {
        "w1": jnp.pad(w1, ((0, 0), (0, Hp - H))).astype(mxu_dtype),
        "b1": jnp.pad(jnp.reshape(b1, (1, H)), ((0, 0), (0, Hp - H))).astype(f32),
        "w2": jnp.pad(w2, ((0, Hp - H), (0, Lp - L))).astype(mxu_dtype),
        "b2": jnp.pad(jnp.reshape(b2, (1, L)), ((0, 0), (0, Lp - L))).astype(f32),
        "H": H,
        "L": L,
    }


# ---------------------------------------------------------------------------
# Wrapper.
# ---------------------------------------------------------------------------
def decoder_mlp(x, params, *, out_dtype=None, max_block_b=512):
    """x: [B, F] (native dtype), params from prepare_params() -> [B, L]."""
    B, F = x.shape
    w1p, b1p, w2p, b2p = params["w1"], params["b1"], params["w2"], params["b2"]
    Hp = w1p.shape[1]
    Lp = w2p.shape[1]
    L = params["L"]
    out_dtype = out_dtype if out_dtype is not None else x.dtype

    x_bytes = jnp.dtype(x.dtype).itemsize
    mxu_bytes = jnp.dtype(w1p.dtype).itemsize
    out_bytes = jnp.dtype(out_dtype).itemsize

    # Generation-aware VMEM budget: ~12 MiB headroom below physical VMEM
    # (v7x: 64 MiB -> ~52 MiB usable), capped at ~100 MiB on v5e/v6e.
    budget = max(32 * 2 ** 20,
                 min(_vmem_capacity_bytes() - 12 * 2 ** 20, 100 * 2 ** 20))

    def vmem_est(bb, w_bufs):
        return (2 * bb * F * x_bytes                      # x tiles (double-buffered)
                + 2 * bb * Lp * out_bytes                 # out tiles (double-buffered)
                + w_bufs * (F * Hp + Hp * Lp) * mxu_bytes  # weights
                + w_bufs * (Hp + Lp) * 4                   # biases
                + bb * (2 * Hp + Lp) * 4)                  # live intermediates

    # Batch tile: single grid step with full-extent blocks (no padding) when
    # the whole batch fits a <=max_block_b tile; otherwise 512-row tiles,
    # shrunk only if the VMEM budget forces it.
    if B <= max_block_b:
        bb, Bp, grid_b = B, B, 1
        xp = x
    else:
        bb = _round_up(max_block_b, 16)
        while bb > 16 and vmem_est(bb, 1) > budget:
            bb //= 2
        Bp = _round_up(B, bb)
        grid_b = Bp // bb
        xp = jnp.pad(x, ((0, Bp - B), (0, 0)))

    cost = pl.CostEstimate(
        flops=2 * Bp * (F * Hp + Hp * Lp),
        transcendentals=Bp * Lp,                           # sigmoid
        bytes_accessed=(xp.size * x_bytes
                        + (w1p.size + w2p.size) * mxu_bytes
                        + (b1p.size + b2p.size) * 4
                        + Bp * Lp * out_bytes),
    )

    def limit_for(w_bufs):
        return int(min(max(int(1.5 * vmem_est(bb, w_bufs)), 32 * 2 ** 20), budget))

    def build(weight_mode, limit):
        def wspec(shape):
            # Grid-invariant (resident) blocks: constant index_map.
            if weight_mode is None:
                return pl.BlockSpec(shape, lambda i: (0, 0))
            return pl.BlockSpec(shape, lambda i: (0, 0), pipeline_mode=weight_mode)

        return pl.pallas_call(
            decoder_mlp_kernel,
            out_shape=jax.ShapeDtypeStruct((Bp, Lp), out_dtype),
            grid_spec=pltpu.PrefetchScalarGridSpec(
                num_scalar_prefetch=0,
                grid=(grid_b,),
                in_specs=[
                    pl.BlockSpec((bb, F), lambda i: (i, 0)),   # x tile over batch
                    wspec((F, Hp)),                            # W1 (resident)
                    wspec((1, Hp)),                            # b1
                    wspec((Hp, Lp)),                           # W2 (resident)
                    wspec((1, Lp)),                            # b2
                ],
                out_specs=pl.BlockSpec((bb, Lp), lambda i: (i, 0)),
            ),
            # TODO(synk): on v7x, when grid_b >= 4, pltpu.CORE_PARALLEL on the
            # batch axis shards it across both TensorCores.
            compiler_params=pltpu.CompilerParams(
                dimension_semantics=("parallel",),
                vmem_limit_bytes=limit),
            cost_estimate=cost,
        )

    args = (xp, w1p, b1p, w2p, b2p)
    try:
        # Single-buffer the grid-invariant weight/bias blocks (constant
        # index_map => a second buffer only wastes VMEM, esp. on v7x).
        out = build(pl.Buffered(1), limit_for(1))(*args)
    except (pltpu.LoweringException, ValueError, NotImplementedError):
        # Narrow fallback: only if single-buffering the resident blocks is
        # rejected; keep default double-buffering (and budget for it).
        out = build(None, limit_for(2))(*args)

    return out[:B, :L]


# ---------------------------------------------------------------------------
# Init / references / demo.
# ---------------------------------------------------------------------------
def init_params(key, in_features, hidden_dim, latent_dim, dtype=jnp.float32):
    """Deterministic PyTorch-Linear-style init (uniform(-1/sqrt(fan_in), ...))."""
    k1, k2, k3, k4 = jax.random.split(key, 4)
    bound1 = 1.0 / (in_features ** 0.5)
    bound2 = 1.0 / (hidden_dim ** 0.5)
    w1 = jax.random.uniform(k1, (in_features, hidden_dim), dtype,
                            minval=-bound1, maxval=bound1)
    b1 = jax.random.uniform(k2, (1, hidden_dim), dtype,
                            minval=-bound1, maxval=bound1)
    w2 = jax.random.uniform(k3, (hidden_dim, latent_dim), dtype,
                            minval=-bound2, maxval=bound2)
    b2 = jax.random.uniform(k4, (1, latent_dim), dtype,
                            minval=-bound2, maxval=bound2)
    return w1, b1, w2, b2


def reference_f32(x, w1, b1, w2, b2):
    h = jnp.maximum(x @ w1 + b1, 0.0)
    return jax.nn.sigmoid(h @ w2 + b2)


def reference_bf16(x, w1, b1, w2, b2):
    # Same precision recipe as the kernel: bf16 MXU inputs, f32 accumulation.
    h = jnp.dot(x.astype(jnp.bfloat16), w1.astype(jnp.bfloat16),
                preferred_element_type=jnp.float32) + b1
    h = jnp.maximum(h, 0.0)
    z = jnp.dot(h.astype(jnp.bfloat16), w2.astype(jnp.bfloat16),
                preferred_element_type=jnp.float32) + b2
    return jax.nn.sigmoid(z)


if __name__ == "__main__":
    # Small demo shapes consistent with the module.  B=64 fits one tile, so
    # the kernel runs a single grid step with no batch padding.
    batch, in_features, hidden_dim, latent_dim = 64, 32, 32, 16

    key = jax.random.PRNGKey(0)
    k_x, k_p = jax.random.split(key)
    x = jax.random.normal(k_x, (batch, in_features), jnp.float32)
    w1, b1, w2, b2 = init_params(k_p, in_features, hidden_dim, latent_dim)

    params = prepare_params(w1, b1, w2, b2)       # one-time weight prep (hoisted)
    out = decoder_mlp(x, params)
    out = jax.block_until_ready(out)
    assert out.shape == (batch, latent_dim)

    ref_lo = reference_bf16(x, w1, b1, w2, b2)    # matches kernel precision
    ref_hi = reference_f32(x, w1, b1, w2, b2)     # pure f32 sanity check
    assert jnp.allclose(out, ref_lo, atol=2e-3, rtol=2e-3), "mismatch vs bf16 ref"
    assert jnp.allclose(out, ref_hi, atol=5e-2, rtol=5e-2), "mismatch vs f32 ref"

    print("KERNEL_OK")
</pallas_src>

<mosaic_0001>
module attributes {stable_mosaic.version = 11 : i64} {
  func.func @decoder_mlp_kernel(%arg0: i32, %arg1: memref<64x32xf32, #tpu.memory_space<vmem>>, %arg2: memref<32x128xbf16, #tpu.memory_space<vmem>>, %arg3: memref<1x128xf32, #tpu.memory_space<vmem>>, %arg4: memref<128x128xbf16, #tpu.memory_space<vmem>>, %arg5: memref<1x128xf32, #tpu.memory_space<vmem>>, %arg6: memref<64x128xf32, #tpu.memory_space<vmem>>) attributes {dimension_semantics = [#tpu.dimension_semantics<parallel>], iteration_bounds = array<i64: 1>, scalar_prefetch = 0 : i64, scratch_operands = 0 : i64, tpu.core_type = #tpu.core_type<tc>, window_params = [{transform_indices = @transform_0, window_bounds = array<i64: 64, 32>}, {pipeline_mode = #tpu.pipeline_mode<synchronous>, transform_indices = @transform_1, window_bounds = array<i64: 32, 128>}, {pipeline_mode = #tpu.pipeline_mode<synchronous>, transform_indices = @transform_2, window_bounds = array<i64: 1, 128>}, {pipeline_mode = #tpu.pipeline_mode<synchronous>, transform_indices = @transform_3, window_bounds = array<i64: 128, 128>}, {pipeline_mode = #tpu.pipeline_mode<synchronous>, transform_indices = @transform_4, window_bounds = array<i64: 1, 128>}, {transform_indices = @transform_5, window_bounds = array<i64: 64, 128>}]} {
    %c0 = arith.constant 0 : index
    %c0_0 = arith.constant 0 : index
    %0 = vector.load %arg1[%c0, %c0_0] : memref<64x32xf32, #tpu.memory_space<vmem>>, vector<64x32xf32>
    %1 = arith.truncf %0 : vector<64x32xf32> to vector<64x32xbf16>
    %c0_1 = arith.constant 0 : index
    %c0_2 = arith.constant 0 : index
    %2 = vector.load %arg2[%c0_1, %c0_2] : memref<32x128xbf16, #tpu.memory_space<vmem>>, vector<32x128xbf16>
    %cst = arith.constant dense<0.000000e+00> : vector<64x128xf32>
    %3 = tpu.matmul %1, %2, %cst {dimension_numbers = #tpu.dot_dimension_numbers<[1], [0], [0], [1], [0, 0, 1, 1], [], []>} : vector<64x32xbf16>, vector<32x128xbf16>, vector<64x128xf32> -> vector<64x128xf32>
    %c0_3 = arith.constant 0 : index
    %c0_4 = arith.constant 0 : index
    %4 = vector.load %arg3[%c0_3, %c0_4] : memref<1x128xf32, #tpu.memory_space<vmem>>, vector<1x128xf32>
    %5 = vector.broadcast %4 : vector<1x128xf32> to vector<64x128xf32>
    %6 = arith.addf %3, %5 : vector<64x128xf32>
    %cst_5 = arith.constant 0.000000e+00 : f32
    %7 = vector.broadcast %cst_5 : f32 to vector<64x128xf32>
    %8 = arith.maximumf %6, %7 : vector<64x128xf32>
    %9 = arith.truncf %8 : vector<64x128xf32> to vector<64x128xbf16>
    %c0_6 = arith.constant 0 : index
    %c0_7 = arith.constant 0 : index
    %10 = vector.load %arg4[%c0_6, %c0_7] : memref<128x128xbf16, #tpu.memory_space<vmem>>, vector<128x128xbf16>
    %cst_8 = arith.constant dense<0.000000e+00> : vector<64x128xf32>
    %11 = tpu.matmul %9, %10, %cst_8 {dimension_numbers = #tpu.dot_dimension_numbers<[1], [0], [0], [1], [0, 0, 1, 1], [], []>} : vector<64x128xbf16>, vector<128x128xbf16>, vector<64x128xf32> -> vector<64x128xf32>
    %c0_9 = arith.constant 0 : index
    %c0_10 = arith.constant 0 : index
    %12 = vector.load %arg5[%c0_9, %c0_10] : memref<1x128xf32, #tpu.memory_space<vmem>>, vector<1x128xf32>
    %13 = vector.broadcast %12 : vector<1x128xf32> to vector<64x128xf32>
    %14 = arith.addf %11, %13 : vector<64x128xf32>
    %15 = arith.negf %14 : vector<64x128xf32>
    %16 = math.exp %15 : vector<64x128xf32>
    %cst_11 = arith.constant 1.000000e+00 : f32
    %17 = vector.broadcast %cst_11 : f32 to vector<64x128xf32>
    %18 = arith.addf %17, %16 : vector<64x128xf32>
    %19 = arith.divf %17, %18 : vector<64x128xf32>
    %c0_12 = arith.constant 0 : index
    %c0_13 = arith.constant 0 : index
    %20 = vector.load %arg6[%c0_12, %c0_13] : memref<64x128xf32, #tpu.memory_space<vmem>>, vector<64x128xf32>
    tpu.vector_store %arg6[%c0_12, %c0_13], %19 {strides = array<i32>} : memref<64x128xf32, #tpu.memory_space<vmem>>, vector<64x128xf32>,
    return
  }
  func.func @transform_0(%arg0: i32) -> (i32, i32) {
    %c0_i32 = arith.constant 0 : i32
    %c0_i32_0 = arith.constant 0 : i32
    return %arg0, %c0_i32 : i32, i32
  }
  func.func @transform_1(%arg0: i32) -> (i32, i32) {
    %c0_i32 = arith.constant 0 : i32
    %c0_i32_0 = arith.constant 0 : i32
    %c0_i32_1 = arith.constant 0 : i32
    return %c0_i32, %c0_i32_0 : i32, i32
  }
  func.func @transform_2(%arg0: i32) -> (i32, i32) {
    %c0_i32 = arith.constant 0 : i32
    %c0_i32_0 = arith.constant 0 : i32
    %c0_i32_1 = arith.constant 0 : i32
    return %c0_i32, %c0_i32_0 : i32, i32
  }
  func.func @transform_3(%arg0: i32) -> (i32, i32) {
    %c0_i32 = arith.constant 0 : i32
    %c0_i32_0 = arith.constant 0 : i32
    %c0_i32_1 = arith.constant 0 : i32
    return %c0_i32, %c0_i32_0 : i32, i32
  }
  func.func @transform_4(%arg0: i32) -> (i32, i32) {
    %c0_i32 = arith.constant 0 : i32
    %c0_i32_0 = arith.constant 0 : i32
    %c0_i32_1 = arith.constant 0 : i32
    return %c0_i32, %c0_i32_0 : i32, i32
  }
  func.func @transform_5(%arg0: i32) -> (i32, i32) {
    %c0_i32 = arith.constant 0 : i32
    %c0_i32_0 = arith.constant 0 : i32
    return %arg0, %c0_i32 : i32, i32
  }
}

</mosaic_0001>

<bundles_post_ra>
// kernel: tpu_custom_call.1
= control target key start
LH: loop header
LB: loop body
LE: loop exit
PB: predicated region body
PF: predicated region fallthrough
CT: control target
= control target key end

     0   :  { %vm57_vm0 = vcmask 261120   ;;  %s611_s0 = inlined_call_operand.vmem [shape: f32[64,32], index: 0, kind: input, shape index: {}]   ;;  %s612_s1 = inlined_call_operand.vmem [shape: bf16[32,128], index: 1, kind: input, shape index: {}]   ;;  %s613_s2 = inlined_call_operand.vmem [shape: f32[1,128], index: 2, kind: input, shape index: {}]   ;;  %s614_s3 = inlined_call_operand.vmem [shape: bf16[128,128], index: 3, kind: input, shape index: {}]   ;;  %s615_s4 = inlined_call_operand.vmem [shape: f32[1,128], index: 4, kind: input, shape index: {}]   ;;  %s616_s5 = inlined_call_operand.hbm [shape: f32[64,128], index: 5, kind: output, shape index: {}]  }
   0x1   :  { %v436_v0 = vld [vmem:[%s612_s1] sm:$0xff]   ;;  %v437_v1 = vld [vmem:[%s612_s1 + $0x8] sm:$0xff]   ;;  %v24_v5 = vld [vmem:[%s611_s0 + $0x10] sm:$0xff] }
   0x2   :  { %397 = vmatprep.subr.bf16.mxu0 %v436_v0  ;;  %v22_v2 = vld [vmem:[%s611_s0] sm:$0xff]  ;;  %v23_v3 = vld [vmem:[%s611_s0 + $0x8] sm:$0xff]  ;;  %v25_v6 = vld [vmem:[%s611_s0 + $0x18] sm:$0xff] }
   0x3   :  { %398 = vmatpush3.bf16.msra.mxu0 %v436_v0  ;;  %v30_v4 = vpack.c.bf16 %v23_v3, %v22_v2  ;;  %v26_v7 = vld [vmem:[%s611_s0 + $0x20] sm:$0xff]  ;;  %v27_v8 = vld [vmem:[%s611_s0 + $0x28] sm:$0xff]  ;;  %v31_v10 = vpack.c.bf16 %v25_v6, %v24_v5  ;;  %v28_v13 = vld [vmem:[%s611_s0 + $0x30] sm:$0xff] }
   0x4   :  { %399 = vmatprep.subr.bf16.mxu0 %v437_v1  ;;  %v438_v9 = vld [vmem:[%s614_s3] sm:$0xff]   ;;  %v439_v11 = vld [vmem:[%s614_s3 + $0x8] sm:$0xff]   ;;  %v32_v12 = vpack.c.bf16 %v27_v8, %v26_v7  ;;  %v440_v14 = vld [vmem:[%s614_s3 + $0x10] sm:$0xff]  }
   0x5   :  { %401 = vmatprep.mubr.msk.bf16.mxu0 %vm57_vm0, %v30_v4  ;;  %409 = vmatprep.subr.bf16.mxu1 %v438_v9  ;;  %v29_v15 = vld [vmem:[%s611_s0 + $0x38] sm:$0xff] }
   0x6   :  { %410 = vmatpush3.bf16.msra.mxu1 %v438_v9 }
   0x7   :  { %400 = vmatpush3.bf16.msra.mxu0 %v437_v1  ;;  %411 = vmatprep.subr.bf16.mxu1 %v439_v11 }
   0xa   :  { %402 = vmatmul.mubr.msk.bf16.vlgmr.msra.gmra.mrb[0].mxu0 %vm57_vm0, %v31_v10  ;;  %412 = vmatpush3.bf16.msra.mxu1 %v439_v11 }
   0xb   :  { %405 = vmatprep.mubr.msk.bf16.mxu0 %vm57_vm0, %v32_v12 }
   0xc   :  { %10 = vsyncpa [#allocation3], 0  ;;  %413 = vmatprep.subr.bf16.mxu1 %v440_v14  ;;  %v441_v16 = vld [vmem:[%s614_s3 + $0x18] sm:$0xff]   ;;  %v33_v17 = vpack.c.bf16 %v29_v15, %v28_v13  ;;  %v442_v18 = vld [vmem:[%s614_s3 + $0x20] sm:$0xff]  }
   0xd   :  { %v443_v19 = vld [vmem:[%s614_s3 + $0x28] sm:$0xff]   ;;  %v444_v20 = vld [vmem:[%s614_s3 + $0x30] sm:$0xff]   ;;  %v445_v21 = vld [vmem:[%s614_s3 + $0x38] sm:$0xff]  }
   0xe   :  { %414 = vmatpush3.bf16.msra.mxu1 %v440_v14  ;;  %v355_v22 = vld [vmem:[%s613_s2] ss:$0 sm:$0xff] }
   0xf   :  { %415 = vmatprep.subr.bf16.mxu1 %v441_v16  ;;  %v362_v51 = vld [vmem:[%s615_s4] ss:$0 sm:$0xff]  ;;  %s502_s4 = smov [#allocation2]  }
  0x10   :  { %s344_s29 = sshll.u32 %s502_s4, 4  ;;  %s345_s29 = int_to_ptr.vmem [resolvable:$true] %s344_s29 }
  0x11   :  { %s478_s1 = scalar_lea.vmem %s345_s29, 1024  ;;  %p483_p1 = scmp.lt.s32.totalorder %s345_s29, %s345_s29 }
  0x12   :  { %406 = vmatmul.mubr.msk.bf16.gmra.mrb[4].mxu0 %vm57_vm0, %v33_v17  ;;  %416 = vmatpush3.bf16.msra.mxu1 %v441_v16  ;;  %p479_p0 = scmp.ne.s32.totalorder %s345_s29, %s478_s1  ;;  %p484_p2 = scmp.lt.s32.totalorder %s478_s1, %s478_s1 }
  0x13   :  { %417 = vmatprep.subr.bf16.mxu1 %v442_v18 }
  0x14   :  { %p485_p3 = por %p484_p2, %p483_p1 }
  0x16   :  { %418 = vmatpush3.bf16.msra.mxu1 %v442_v18  ;;  %p486_p4 = pnand %p485_p3, %p479_p0 }
  0x17   :  { %419 = vmatprep.subr.bf16.mxu1 %v443_v19 }
  0x1a   :  { %420 = vmatpush3.bf16.msra.mxu1 %v443_v19 }
  0x1b   :  { %421 = vmatprep.subr.bf16.mxu1 %v444_v20 }
  0x1e   :  { %422 = vmatpush3.bf16.msra.mxu1 %v444_v20 }
  0x1f   :  { %423 = vmatprep.subr.bf16.mxu1 %v445_v21 }
  0x22   :  { %424 = vmatpush3.bf16.msra.mxu1 %v445_v21 }
  0xdd   :  { %v403_v23 = vpop.f32.mrb[0].mxu0 }
  0xde   :  { %v113_v24 = vadd.f32 %v403_v23, %v355_v22  ;;  %v104_v25 = vpop.f32.mrb[1].mxu0 }
  0xdf   :  { %v105_v26 = vadd.f32 %v355_v22, %v104_v25  ;;  %v404_v27 = vpop.f32.mrb[2].mxu0 }
  0xe0   :  { %v116_v28 = vadd.f32 %v404_v27, %v355_v22  ;;  %v107_v29 = vpop.f32.mrb[3].mxu0  ;;  %v137_v31 = vmax.f32 %v113_v24, 0.0 }
  0xe1   :  { %v108_v30 = vadd.f32 %v355_v22, %v107_v29  ;;  %v135_v33 = vmax.f32 %v105_v26, 0.0 }
  0xe2   :  { %v138_v32 = vmax.f32 %v116_v28, 0.0 }
  0xe3   :  { %v136_v34 = vmax.f32 %v108_v30, 0.0 }
  0xe4   :  { %v144_v35 = vpack.c.bf16 %v138_v32, %v137_v31 }
  0xe5   :  { %v407_v36 = vpop.f32.mrb[4].mxu0  ;;  %v143_v37 = vpack.c.bf16 %v136_v34, %v135_v33 }
  0xe6   :  { %v129_v38 = vadd.f32 %v407_v36, %v355_v22  ;;  %v120_v39 = vpop.f32.mrb[5].mxu0 }
  0xe7   :  { %v121_v40 = vadd.f32 %v355_v22, %v120_v39  ;;  %v408_v41 = vpop.f32.mrb[6].mxu0  ;;  %425 = vmatprep.mubr.bf16.mxu1 %v143_v37 }
  0xe8   :  { %v132_v42 = vadd.f32 %v408_v41, %v355_v22  ;;  %v123_v43 = vpop.f32.mrb[7].mxu0  ;;  %426 = vmatmul.mubr.bf16.vlgmr.msra.gmra.mrb[0].mxu1 %v144_v35  ;;  %v141_v45 = vmax.f32 %v129_v38, 0.0 }
  0xe9   :  { %v124_v44 = vadd.f32 %v355_v22, %v123_v43  ;;  %v139_v47 = vmax.f32 %v121_v40, 0.0 }
  0xea   :  { %v142_v46 = vmax.f32 %v132_v42, 0.0 }
  0xeb   :  { %v140_v48 = vmax.f32 %v124_v44, 0.0 }
  0xec   :  { %v146_v49 = vpack.c.bf16 %v142_v46, %v141_v45 }
  0xed   :  { %v145_v50 = vpack.c.bf16 %v140_v48, %v139_v47 }
  0xef   :  { %429 = vmatprep.mubr.bf16.mxu1 %v145_v50 }
  0xf0   :  { %430 = vmatmul.mubr.bf16.gmra.mrb[4].mxu1 %v146_v49 }
 0x1bb   :  { %v427_v52 = vpop.f32.mrb[0].mxu1 }
 0x1bc   :  { %v261_v53 = vadd.f32 %v427_v52, %v362_v51  ;;  %v252_v54 = vpop.f32.mrb[1].mxu1 }
 0x1bd   :  { %v253_v55 = vadd.f32 %v362_v51, %v252_v54  ;;  %v428_v56 = vpop.f32.mrb[2].mxu1 }
 0x1be   :  { %v373_v57 = vmul.f32 -1.442695, %v261_v53  ;;  %v264_v58 = vadd.f32 %v428_v56, %v362_v51  ;;  %v255_v59 = vpop.f32.mrb[3].mxu1 }
 0x1bf   :  { %v371_v60 = vmul.f32 -1.442695, %v253_v55  ;;  %v256_v61 = vadd.f32 %v362_v51, %v255_v59 }
 0x1c0   :  { %446 = vpow2.f32 %v373_v57  ;;  %v374_v62 = vmul.f32 -1.442695, %v264_v58 }
 0x1c1   :  { %448 = vpow2.f32 %v371_v60  ;;  %v372_v63 = vmul.f32 -1.442695, %v256_v61 }
 0x1c2   :  { %450 = vpow2.f32 %v374_v62 }
 0x1c3   :  { %452 = vpow2.f32 %v372_v63  ;;  %v431_v0 = vpop.f32.mrb[4].mxu1 }
 0x1c4   :  { %v277_v1 = vadd.f32 %v431_v0, %v362_v51  ;;  %v268_v2 = vpop.f32.mrb[5].mxu1 }
 0x1c5   :  { %v269_v3 = vadd.f32 %v362_v51, %v268_v2  ;;  %v432_v4 = vpop.f32.mrb[6].mxu1 }
 0x1c6   :  { %v377_v5 = vmul.f32 -1.442695, %v277_v1  ;;  %v280_v6 = vadd.f32 %v432_v4, %v362_v51  ;;  %v271_v7 = vpop.f32.mrb[7].mxu1 }
 0x1c7   :  { %v375_v8 = vmul.f32 -1.442695, %v269_v3  ;;  %v272_v9 = vadd.f32 %v362_v51, %v271_v7 }
 0x1c8   :  { %454 = vpow2.f32 %v377_v5  ;;  %v378_v10 = vmul.f32 -1.442695, %v280_v6 }
 0x1c9   :  { %456 = vpow2.f32 %v375_v8  ;;  %v376_v11 = vmul.f32 -1.442695, %v272_v9 }
 0x1ca   :  { %v447_v12 = vpop.eup %446  ;;  %458 = vpow2.f32 %v378_v10 }
 0x1cb   :  { %v449_v13 = vpop.eup %448  ;;  %v309_v14 = vadd.f32 1.0, %v447_v12  ;;  %460 = vpow2.f32 %v376_v11 }
 0x1cc   :  { %v451_v15 = vpop.eup %450  ;;  %v307_v16 = vadd.f32 1.0, %v449_v13 }
 0x1cd   :  { %v453_v17 = vpop.eup %452  ;;  %462 = vrcp.f32 %v309_v14  ;;  %v310_v18 = vadd.f32 1.0, %v451_v15 }
 0x1ce   :  { %464 = vrcp.f32 %v307_v16  ;;  %v308_v19 = vadd.f32 1.0, %v453_v17 }
 0x1cf   :  { %466 = vrcp.f32 %v310_v18 }
 0x1d0   :  { %468 = vrcp.f32 %v308_v19 }
 0x1d2   :  { %v455_v20 = vpop.eup %454 }
 0x1d3   :  { %v457_v21 = vpop.eup %456  ;;  %v313_v22 = vadd.f32 1.0, %v455_v20 }
 0x1d4   :  { %v459_v23 = vpop.eup %458  ;;  %v311_v24 = vadd.f32 1.0, %v457_v21 }
 0x1d5   :  { %v461_v25 = vpop.eup %460  ;;  %470 = vrcp.f32 %v313_v22  ;;  %v314_v26 = vadd.f32 1.0, %v459_v23 }
 0x1d6   :  { %472 = vrcp.f32 %v311_v24  ;;  %v312_v27 = vadd.f32 1.0, %v461_v25 }
 0x1d7   :  { %v463_v28 = vpop.eup %462  ;;  %474 = vrcp.f32 %v314_v26 }
 0x1d8   :  { %v465_v29 = vpop.eup %464  ;;  %333 = vst [vmem:[#allocation2 + $0x10] sm:$0xff] %v463_v28  ;;  %476 = vrcp.f32 %v312_v27 }
 0x1d9   :  { %v467_v30 = vpop.eup %466  ;;  %331 = vst [vmem:[#allocation2] sm:$0xff] %v465_v29 }
 0x1da   :  { %v469_v31 = vpop.eup %468  ;;  %334 = vst [vmem:[#allocation2 + $0x18] sm:$0xff] %v467_v30 }
 0x1db   :  { %332 = vst [vmem:[#allocation2 + $0x8] sm:$0xff] %v469_v31 }
 0x1df   :  { %v471_v32 = vpop.eup %470 }
 0x1e0   :  { %v473_v33 = vpop.eup %472  ;;  %337 = vst [vmem:[#allocation2 + $0x30] sm:$0xff] %v471_v32 }
 0x1e1   :  { %v475_v34 = vpop.eup %474  ;;  %335 = vst [vmem:[#allocation2 + $0x20] sm:$0xff] %v473_v33 }
 0x1e2   :  { %v477_v35 = vpop.eup %476  ;;  %338 = vst [vmem:[#allocation2 + $0x38] sm:$0xff] %v475_v34 }
 0x1e3   :  { %336 = vst [vmem:[#allocation2 + $0x28] sm:$0xff] %v477_v35 }
 0x1e4   :  { %489 = shalt.err (!%p486_p4)
}
 0x1e5   :  { %s490_s7 = scalar_lea.hbm %s616_s5, 1024 }
 0x1e6   :  { %p491_p5 = scmp.ne.s32.totalorder %s616_s5, %s490_s7  ;;  %p494_p6 = scmp.lt.u32.totalorder %s490_s7, %s616_s5 }
 0x1e8   :  { %p496_p7 = pnand %p494_p6, %p491_p5 }
 0x1ea   :  { %499 = shalt.err (!%p496_p7)
}
 0x1eb   :  { %s503_s12 = smov 128   ;;  %s504_s13 = smov 8  }
 0x1ec   :  { %350 = dma.vmem_to_hbm [thread:$0]  %s345_s29, 1024, %s616_s5, [#allocation3], %s503_s12, %s503_s12, %s504_s13  }
 0x1ed   :  { %500 = dma.done.wait [#allocation3], 1024  }
 0x1ee   :  { %501 = vsyncadd [#allocation3], 4294966272 }
 0x1ef   :  { %354 = vsyncpa [#allocation3], 1 }

</bundles_post_ra>
